<compile_context>
chip_gen: v6e
topology: v6e:2x2x1
jax: 0.10.0
libtpu: 0.0.40
codegen_flags: <defaults>
</compile_context>

<pallas_src>
import math
from dataclasses import dataclass

import jax
import jax.numpy as jnp
from jax.experimental import pallas as pl
from jax.experimental.pallas import tpu as pltpu


@dataclass
class LinearWeight:
    weight: jnp.ndarray = None
    bias: jnp.ndarray = None


_LANE = 128
_E_ALIGN = 16                 # bf16 sublane packing
_TARGET_TILE_BYTES = 4 << 20  # aim ~4 MiB per streamed weight tile
_MAX_TILE_BYTES = 10 << 20    # => <= ~20 MiB double-buffered (v7x 64 MiB safe)
_SMALL_N = 4096               # below this, a plain fused GEMV beats pallas overhead


def _round_up(x, m):
    return ((x + m - 1) // m) * m


def _cdiv(a, b):
    return (a + b - 1) // b


def _hypernet_kernel(emb_ref, w_ref, b_ref, out_ref):
    # emb_ref: (1, E_pad) bf16, kept resident (same block every step)
    # w_ref:   (E_pad, TN) bf16, streamed contiguous tile of the fused matrix
    # b_ref / out_ref: (1, TN) f32
    out_ref[...] = (
        jnp.dot(emb_ref[...], w_ref[...], preferred_element_type=jnp.float32)
        + b_ref[...]
    )


def _choose_tile_n(n_total, e_pad, bytes_per_elem):
    """Pick a lane-dense tile width scaled to E (multi-MiB streamed tiles)."""
    n128 = _round_up(n_total, _LANE)
    per_col_bytes = e_pad * bytes_per_elem
    tile_n = (_TARGET_TILE_BYTES // per_col_bytes) // _LANE * _LANE
    tile_max = max((_MAX_TILE_BYTES // per_col_bytes) // _LANE * _LANE, _LANE)
    tile_n = max(_LANE, min(tile_n, tile_max))
    tile_n = min(tile_n, n128)
    # keep >= 2 grid steps so v7x can shard columns across both TensorCores
    if n128 >= 2 * _LANE:
        tile_n = min(tile_n, _round_up(_cdiv(n128, 2), _LANE))
        while tile_n > _LANE and _cdiv(n128, tile_n) < 2:
            tile_n -= _LANE
    # limit zero-padding waste (wasted HBM bytes) to ~5% of the stream
    while tile_n > _LANE:
        n_pad = _round_up(n_total, tile_n)
        if (n_pad - n_total) * 20 <= n_pad:
            break
        tile_n -= _LANE
    return int(tile_n)


def prepare_params(params, input_dim, output_dim, weight_dtype=jnp.bfloat16):
    """One-time parameter prep (NOT in the per-call path): fuse, transpose,
    pad, cast to bf16 and pre-tile into contiguous per-step chunks.

    params holds nn.Linear-style tensors:
      weight_generator.weight (I*O, E), .bias (I*O,)
      bias_generator.weight   (O, E),   .bias (O,)
    """
    IO = input_dim * output_dim
    wg = params["weight_generator"]["weight"]
    bg = params["weight_generator"]["bias"]
    wb = params["bias_generator"]["weight"]
    bb = params["bias_generator"]["bias"]
    E = wg.shape[1]
    e_pad = _round_up(E, _E_ALIGN)

    n_total = IO + output_dim
    bpe = jnp.dtype(weight_dtype).itemsize

    # Fuse both generators into one pre-transposed (E, I*O + O) matrix so the
    # kernel is a single streaming GEMV with one lane-dense output.
    w_fused = jnp.concatenate([wg, wb], axis=0).T.astype(jnp.float32)  # (E, n_total)
    b_fused = jnp.concatenate([bg, bb], axis=0).astype(jnp.float32)    # (n_total,)

    tile_n = _choose_tile_n(n_total, e_pad, bpe)
    n_pad = _round_up(n_total, tile_n)
    n_tiles = n_pad // tile_n

    # Zero-pad E (sublane alignment) and N (full lane-dense tiles).
    w_fused = jnp.pad(w_fused, ((0, e_pad - E), (0, n_pad - n_total)))
    b_fused = jnp.pad(b_fused, (0, n_pad - n_total)).reshape(1, n_pad)

    # Pre-tile into contiguous (n_tiles, e_pad, tile_n): one contiguous HBM
    # burst per grid step instead of e_pad short strided rows.
    w_tiled = (
        w_fused.reshape(e_pad, n_tiles, tile_n)
        .transpose(1, 0, 2)
        .astype(weight_dtype)
    )

    prepared = {
        "w_tiled": w_tiled,            # (n_tiles, e_pad, tile_n) bf16
        "b_fused": b_fused,            # (1, n_pad) f32
        "tile_n": int(tile_n),
        "n_pad": int(n_pad),
        "n_total": int(n_total),
        "embedding_dim": int(E),
        "e_pad": int(e_pad),
        "weight_dtype": weight_dtype,
    }
    if n_total <= _SMALL_N:
        # Tiny problems: keep a dense fused copy for the non-Pallas fast path.
        prepared["w_dense"] = w_fused.astype(weight_dtype)  # (e_pad, n_pad)
    # TODO(synk): optional fp8 weights + per-column scale on v7x (quarter the
    # HBM stream vs f32) once hypernet output quality at fp8 is validated.
    return prepared


def base_hypernet_forward(embeddings, prepared, input_dim, output_dim,
                          *, force_pallas=False):
    """embeddings: (E,) or (1, E). Returns LinearWeight(weight=(O,I), bias=(O,))."""
    E = prepared["embedding_dim"]
    e_pad = prepared["e_pad"]
    IO = input_dim * output_dim
    wdt = prepared["weight_dtype"]
    bpe = jnp.dtype(wdt).itemsize

    emb = embeddings.reshape(1, -1).astype(jnp.float32)
    emb = jnp.pad(emb, ((0, 0), (0, e_pad - E))).astype(wdt)  # (1, e_pad) bf16

    n_pad = prepared["n_pad"]
    tile_n = prepared["tile_n"]
    b_fused = prepared["b_fused"]

    if not force_pallas and "w_dense" in prepared:
        # Tiny problem: pallas_call launch/padding overhead dominates; a plain
        # fused GEMV (still bf16 weights, f32 accumulate) is as fast or faster.
        out = (
            jnp.dot(emb, prepared["w_dense"], preferred_element_type=jnp.float32)
            + b_fused
        )
    else:
        w_tiled = prepared["w_tiled"]
        n_tiles = n_pad // tile_n

        # VMEM budget: double-buffered streamed weight tile dominates; bias/out
        # tiles and resident emb are tiny; add headroom for compiler scratch.
        needed = (
            2 * e_pad * tile_n * bpe        # weight tile, double-buffered
            + 2 * 2 * 4 * tile_n            # bias + out tiles, double-buffered, f32
            + 2 * e_pad * bpe               # resident embedding
            + (4 << 20)
        )
        # Lift the 16/32 MiB scoped defaults (v5e/v6e) but cap at 48 MiB so v7x
        # (64 MiB physical) keeps >= 16 MiB headroom.
        vmem_limit = int(min(max(needed, 32 << 20), 48 << 20))

        cost = pl.CostEstimate(
            flops=2 * e_pad * n_pad,
            transcendentals=0,
            bytes_accessed=e_pad * n_pad * bpe + 2 * 4 * n_pad + e_pad * bpe,
        )

        out = pl.pallas_call(
            _hypernet_kernel,
            out_shape=jax.ShapeDtypeStruct((1, n_pad), jnp.float32),
            grid=(n_tiles,),
            in_specs=[
                pl.BlockSpec((1, e_pad), lambda j: (0, 0)),               # emb, resident
                pl.BlockSpec((None, e_pad, tile_n), lambda j: (j, 0, 0)),  # weight tile, contiguous DMA
                pl.BlockSpec((1, tile_n), lambda j: (0, j)),              # fused bias tile
            ],
            out_specs=pl.BlockSpec((1, tile_n), lambda j: (0, j)),
            compiler_params=pltpu.CompilerParams(
                dimension_semantics=("parallel",),   # v7x: split columns over 2 TCs
                vmem_limit_bytes=vmem_limit,
            ),
            cost_estimate=cost,
        )(emb, w_tiled, b_fused)

    weight = out[0, :IO].reshape(output_dim, input_dim)       # .view(O, I)
    bias = out[0, IO:IO + output_dim].reshape(-1)             # .view(-1)
    return LinearWeight(weight=weight, bias=bias)


def init_params(key, embedding_dim, input_dim, output_dim):
    """Deterministic init mimicking nn.Linear's uniform(-1/sqrt(fan_in), ...)."""
    k1, k2, k3, k4 = jax.random.split(key, 4)
    bound = 1.0 / math.sqrt(embedding_dim)
    IO = input_dim * output_dim
    return {
        "weight_generator": {
            "weight": jax.random.uniform(
                k1, (IO, embedding_dim), jnp.float32, -bound, bound),
            "bias": jax.random.uniform(k2, (IO,), jnp.float32, -bound, bound),
        },
        "bias_generator": {
            "weight": jax.random.uniform(
                k3, (output_dim, embedding_dim), jnp.float32, -bound, bound),
            "bias": jax.random.uniform(
                k4, (output_dim,), jnp.float32, -bound, bound),
        },
    }


if __name__ == "__main__":
    embedding_dim = 32
    input_dim = 16
    output_dim = 8

    key = jax.random.PRNGKey(0)
    pkey, ekey = jax.random.split(key)
    params = init_params(pkey, embedding_dim, input_dim, output_dim)
    prepared = prepare_params(params, input_dim, output_dim)
    embeddings = jax.random.normal(ekey, (embedding_dim,), jnp.float32)

    # force_pallas so the Pallas kernel itself runs at this tiny demo size
    out = base_hypernet_forward(embeddings, prepared, input_dim, output_dim,
                                force_pallas=True)
    jax.block_until_ready(out.weight)
    jax.block_until_ready(out.bias)

    # sanity check vs plain-JAX f32 reference on the original (unfused) params;
    # kernel weights are bf16 (f32 accumulation) => relaxed tolerance.
    ref_w = (embeddings @ params["weight_generator"]["weight"].T
             + params["weight_generator"]["bias"]).reshape(output_dim, input_dim)
    ref_b = (embeddings @ params["bias_generator"]["weight"].T
             + params["bias_generator"]["bias"]).reshape(-1)
    assert out.weight.shape == (output_dim, input_dim)
    assert out.bias.shape == (output_dim,)
    assert jnp.allclose(out.weight, ref_w, atol=5e-2, rtol=5e-2)
    assert jnp.allclose(out.bias, ref_b, atol=5e-2, rtol=5e-2)

    print("KERNEL_OK")
</pallas_src>

<mosaic_0001>
module attributes {stable_mosaic.version = 11 : i64} {
  func.func @_hypernet_kernel(%arg0: i32, %arg1: memref<1x32xbf16, #tpu.memory_space<vmem>>, %arg2: memref<1x32x128xbf16, #tpu.memory_space<vmem>>, %arg3: memref<1x128xf32, #tpu.memory_space<vmem>>, %arg4: memref<1x128xf32, #tpu.memory_space<vmem>>) attributes {dimension_semantics = [#tpu.dimension_semantics<parallel>], iteration_bounds = array<i64: 2>, scalar_prefetch = 0 : i64, scratch_operands = 0 : i64, tpu.core_type = #tpu.core_type<tc>, window_params = [{pipeline_mode = #tpu.pipeline_mode<synchronous>, transform_indices = @transform_0, window_bounds = array<i64: 1, 32>}, {transform_indices = @transform_1, window_bounds = array<i64: 1, 32, 128>}, {transform_indices = @transform_2, window_bounds = array<i64: 1, 128>}, {transform_indices = @transform_3, window_bounds = array<i64: 1, 128>}]} {
    %c0 = arith.constant 0 : index
    %c0_0 = arith.constant 0 : index
    %0 = vector.load %arg1[%c0, %c0_0] : memref<1x32xbf16, #tpu.memory_space<vmem>>, vector<1x32xbf16>
    %c0_1 = arith.constant 0 : index
    %c0_2 = arith.constant 0 : index
    %c0_3 = arith.constant 0 : index
    %1 = vector.load %arg2[%c0_1, %c0_2, %c0_3] : memref<1x32x128xbf16, #tpu.memory_space<vmem>>, vector<1x32x128xbf16>
    %2 = vector.shape_cast %1 : vector<1x32x128xbf16> to vector<32x128xbf16>
    %cst = arith.constant dense<0.000000e+00> : vector<1x128xf32>
    %3 = tpu.matmul %0, %2, %cst {dimension_numbers = #tpu.dot_dimension_numbers<[1], [0], [0], [1], [0, 0, 1, 1], [], []>} : vector<1x32xbf16>, vector<32x128xbf16>, vector<1x128xf32> -> vector<1x128xf32>
    %c0_4 = arith.constant 0 : index
    %c0_5 = arith.constant 0 : index
    %4 = vector.load %arg3[%c0_4, %c0_5] : memref<1x128xf32, #tpu.memory_space<vmem>>, vector<1x128xf32>
    %5 = arith.addf %3, %4 : vector<1x128xf32>
    %c0_6 = arith.constant 0 : index
    %c0_7 = arith.constant 0 : index
    %6 = vector.load %arg4[%c0_6, %c0_7] : memref<1x128xf32, #tpu.memory_space<vmem>>, vector<1x128xf32>
    tpu.vector_store %arg4[%c0_6, %c0_7], %5 {strides = array<i32>} : memref<1x128xf32, #tpu.memory_space<vmem>>, vector<1x128xf32>,
    return
  }
  func.func @transform_0(%arg0: i32) -> (i32, i32) {
    %c0_i32 = arith.constant 0 : i32
    %c0_i32_0 = arith.constant 0 : i32
    %c0_i32_1 = arith.constant 0 : i32
    return %c0_i32, %c0_i32_0 : i32, i32
  }
  func.func @transform_1(%arg0: i32) -> (i32, i32, i32) {
    %c0_i32 = arith.constant 0 : i32
    %c0_i32_0 = arith.constant 0 : i32
    %c0_i32_1 = arith.constant 0 : i32
    return %arg0, %c0_i32, %c0_i32_0 : i32, i32, i32
  }
  func.func @transform_2(%arg0: i32) -> (i32, i32) {
    %c0_i32 = arith.constant 0 : i32
    %c0_i32_0 = arith.constant 0 : i32
    return %c0_i32, %arg0 : i32, i32
  }
  func.func @transform_3(%arg0: i32) -> (i32, i32) {
    %c0_i32 = arith.constant 0 : i32
    %c0_i32_0 = arith.constant 0 : i32
    return %c0_i32, %arg0 : i32, i32
  }
}

</mosaic_0001>

<bundles_post_ra>
// kernel: tpu_custom_call.1
= control target key start
LH: loop header
LB: loop body
LE: loop exit
PB: predicated region body
PF: predicated region fallthrough
CT: control target
= control target key end

     0   :  { %8 = vsyncpa [#allocation3], 0  ;;  %s806_s0 = inlined_call_operand.hbm [shape: bf16[1,32], index: 0, kind: input, shape index: {}]   ;;  %s807_s1 = inlined_call_operand.hbm [shape: bf16[2,32,128], index: 1, kind: input, shape index: {}]   ;;  %s808_s2 = inlined_call_operand.vmem [shape: f32[1,256], index: 2, kind: input, shape index: {}]   ;;  %s809_s3 = inlined_call_operand.hbm [shape: f32[1,256], index: 3, kind: output, shape index: {}]  }
   0x1   :  { %9 = vsyncpa [#allocation6], 0 }
   0x2   :  { %11 = vsyncpa [#allocation6 + $0x1], 0 }
   0x3   :  { %12 = vsyncpa [#allocation4], 0 }
   0x4   :  { %14 = vsyncpa [#allocation4 + $0x1], 0  ;;  %s621_s12 = smov 0   ;;  %s623_s13 = smov 0  }
   0x5   :  { %s625_s14 = smov 0   ;;  %s627_s15 = smov 0  }
   0x6 LB: > { %s642_s16 = sadd.s32 4294967295, %s592_s15   ;;  %s379_s17 = sadd.s32 4294967294, %s592_s15   ;;  %s592_s15 = sphi %s627_s15, %s832_s15   ;;  %s588_s14 = sphi %s625_s14, %s831_s14   ;;  %s584_s13 = sphi %s623_s13, %s830_s13   ;;  %s580_s12 = sphi %s621_s12, %s829_s12  }
   0x7   : > { %s646_s18 = sadd.s32 1, %s592_s15   ;;  %s48_s19 = sadd.s32 1, %s588_s14 }
   0x8   : > { %s45_s20 = ssub.s32 %s592_s15, %s646_s18  ;;  %p55_p0 = scmp.ne.s32.totalorder %s588_s14, %s584_s13 }
   0x9   : > { %p46_p1 = scmp.eq.s32.totalorder %s45_s20, 0  ;;  %p56_p2 = scmp.eq.s32.totalorder %s592_s15, 0 }
   0xa   : > { %p61_p3 = scmp.ne.s32.totalorder %s584_s13, %s580_s12  ;;  %p810_p4 = scmp.eq.s32.totalorder %s642_s16, 0 }
   0xb   : > { %s658_s21 = scalar_select %p46_p1, %s588_s14, %s48_s19  }
   0xc   : > { %p660_p5 = por %p56_p2, %p55_p0  ;;  %p666_p6 = por %p810_p4, %p61_p3 }
   0xd   : > { %p111_p7 = scmp.eq.s32.totalorder %s642_s16, 1  ;;  %p117_p8 = scmp.eq.s32.totalorder %s379_s17, 1 }
   0xe   : > { %s815_s23 = scalar_select %p666_p6, 1, 0 }
   0xf   : > { %p380_p9 = scmp.ge.s32.totalorder %s592_s15, 1  ;;  %p124_p10 = scmp.lt.s32.totalorder %s592_s15, 3 }
  0x10   : > { %p673_p11 = por %p111_p7, %p55_p0  ;;  %p677_p12 = por %p117_p8, %p61_p3 }
  0x11   : > { %p681_p13 = pnand %p380_p9, %p124_p10  ;;  %s594_s27 = smov [#allocation2]  }
  0x12   : > { %s816_s24 = scalar_select %p673_p11, 1, 0 }
  0x13   : > { %s817_s25 = scalar_select %p677_p12, 1, 0 }
  0x14   : > { %s818_s26 = scalar_select %p681_p13, 1, 0 }
  0x15   : > { %p415_p2 = pneg %p681_p13  ;;  %s137_s28 = sshll.u32 %s594_s27, 4  ;;  %s138_s28 = int_to_ptr.vmem [resolvable:$true] %s137_s28 }
  0x16   : > { %p428_p4 = scmp.lt.s32.totalorder %s592_s15, 2  ;;  %p819_p0 = scmp.eq.s32.totalorder %s642_s16, 0 }
  0x17   : > { %s148_s30 = sand.u32 1, %s588_s14   ;;  %s481_s6 = scalar_lea.vmem %s138_s28, 16 }
  0x18   : > { %p691_p7 = pnand %p415_p2, %p819_p0  ;;  %p698_p3 = pnand %p428_p4, %p660_p5 }
  0x19   : > { %s383_s5 = sshll.u32 %s148_s30, 4  ;;  %p482_p9 = scmp.ne.s32.totalorder %s138_s28, %s481_s6 }
  0x1a   : > { %p472_p8 = pneg %p691_p7  ;;  %s488_s7 = scalar_lea.vmem %s138_s28, 32 }
  0x1b   : > { %p489_p12 = scmp.lt.s32.totalorder %s138_s28, %s138_s28  ;;  %p490_p2 = scmp.lt.s32.totalorder %s488_s7, %s481_s6 }
  0x1c   : > { %p484_p10 = pnand %p482_p9, %p472_p8 }
  0x1d   : > { %p491_p0 = por %p490_p2, %p489_p12 }
  0x1e   : > { %p485_p1 = pneg %p484_p10 }
  0x20   : > { %p492_p11 = pnand %p491_p0, %p485_p1 }
  0x22   : > { %495 = shalt.err (!%p492_p11)
}
  0x23   : > { %418 = dma.hbm_to_vmem [thread:$0]  (!%p691_p7), %s806_s0, 16, %s138_s28, [#allocation3]  }
  0x24   : > { %s395_s10 = sshll.u32 %s592_s15, 8  ;;  %s152_s11 = scalar_lea.vmem [#allocation5], %s383_s5 }
  0x25   : > { %s159_s17 = sshll.u32 %s152_s11, 4  ;;  %s713_s22 = scalar_lea.hbm %s807_s1, %s395_s10  ;;  %s715_s17 = int_to_ptr.vmem [resolvable:$true] %s159_s17 }
  0x26   : > { %s717_s27 = scalar_lea.sflag [#allocation6], %s148_s30  ;;  %s496_s29 = scalar_lea.hbm %s713_s22, 256 }
  0x27   : > { %p497_p4 = scmp.ne.s32.totalorder %s713_s22, %s496_s29  ;;  %p498_p5 = pneg %p698_p3 }
  0x28   : > { %s501_s6 = scalar_lea.hbm %s807_s1, 512  ;;  %p502_p1 = scmp.lt.s32.totalorder %s713_s22, %s807_s1 }
  0x29   : > { %p499_p11 = pnand %p498_p5, %p497_p4  ;;  %p503_p7 = scmp.lt.s32.totalorder %s501_s6, %s496_s29 }
  0x2b   : > { %p500_p12 = pneg %p499_p11  ;;  %p504_p8 = por %p503_p7, %p502_p1 }
  0x2d   : > { %p505_p9 = pnand %p504_p8, %p500_p12 }
  0x2f   : > { %508 = shalt.err (!%p505_p9)
}
  0x30   : > { %s509_s30 = scalar_lea.vmem %s715_s17, 256  ;;  %s595_s9 = smov [#allocation5]  }
  0x31   : > { %p510_p10 = scmp.ne.s32.totalorder %s715_s17, %s509_s30  ;;  %s514_s10 = sshll.u32 %s595_s9, 4  ;;  %s515_s10 = int_to_ptr.vmem [resolvable:$false] %s514_s10 }
  0x32   : > { %s516_s11 = scalar_lea.vmem %s515_s10, 512  ;;  %p517_p4 = scmp.lt.s32.totalorder %s715_s17, %s515_s10 }
  0x33   : > { %p512_p2 = pnand %p510_p10, %p498_p5  ;;  %p518_p11 = scmp.lt.s32.totalorder %s516_s11, %s509_s30 }
  0x35   : > { %p513_p0 = pneg %p512_p2  ;;  %p519_p6 = por %p518_p11, %p517_p4 }
  0x37   : > { %p520_p13 = pnand %p519_p6, %p513_p0 }
  0x39   : > { %523 = shalt.err (!%p520_p13)
}
  0x3a   : > { %s596_s19 = smov 64   ;;  %s597_s20 = smov 4  }
  0x3b   : > { %422 = dma.hbm_to_vmem [thread:$0]  (!%p698_p3), %s713_s22, 256, %s715_s17, %s717_s27, %s596_s19, %s596_s19, %s597_s20  }
  0x3c   : > { %p822_p5 = scmp.ne.s32.totalorder %s818_s26, 0 }
  0x3d   : > { %p823_p12 = scmp.eq.s32.totalorder (!%p822_p5), %s642_s16, 0 }
  0x3e   : > { %177 = sbr.rel (%p822_p5) target bundleno = 290 (0x122), region = 32 }
  0x43   : > { %567 = dma.done.wait (%p823_p12), [#allocation3], 16   ;;  %p824_p1 = pmov %p823_p12 }
  0x44   : > { %s745_s29 = sand.u32 1, %s584_s13   ;;  %p825_p6 = scmp.ne.s32.totalorder %s815_s23, 0 }
  0x45   : > { %569 = vsyncadd (%p824_p1), [#allocation3], 4294967280  ;;  %s388_s28 = sshll.u32 %s745_s29, 4  ;;  %s184_s5 = scalar_lea.sflag [#allocation6], %s745_s29 }
  0x46   : > { %s187_s6 = scalar_lea.vmem [#allocation5], %s388_s28 }
  0x47   : > { %571 = dma.done.wait (%p825_p6), %s184_s5, 256  }
  0x48   : > { %573 = vsyncadd (%p825_p6), %s184_s5, 4294967040  ;;  %v598_v0 = vmov 0.0   ;;  %vm599_vm0 = vmmov 0   ;;  %v468_v1 = vld [vmem:[%s187_s6 + $0x8] sm:$0xff]   ;;  %v469_v2 = vld [vmem:[%s187_s6] sm:$0xff]   ;;  %vm234_vm1 = vcmask 261120  }
  0x49   : > { %399 = vmatprep.subr.bf16.mxu0 %v598_v0  ;;  %403 = vmatprep.mubr.msk.bf16.mxu0 %vm599_vm0, %v598_v0  ;;  %v216_v3 = vld [vmem:[#allocation2] sm:$0x1]  ;;  %p212_p13 = scmp.lt.s32.totalorder %s642_s16, 1  ;;  %s392_s22 = sshll.u32 %s642_s16, 4 }
  0x4a   : > { %400 = vmatpush3.bf16.msra.mxu0 %v468_v1  ;;  %s211_s27 = scalar_lea.vmem [#allocation7], %s745_s29  ;;  %s763_s9 = scalar_lea.hbm %s809_s3, %s392_s22 }
  0x4b   : > { %401 = vmatprep.subr.bf16.mxu0 %v598_v0  ;;  %s213_s23 = scalar_select %p212_p13, %s642_s16, 1 }
  0x4c   : > { %s292_s7 = sshll.u32 %s211_s27, 4  ;;  %s280_s10 = scalar_lea.sflag [#allocation4], %s745_s29  ;;  %s765_s7 = int_to_ptr.vmem [resolvable:$true] %s292_s7 }
  0x4d   : > { %s214_s17 = scalar_lea.vmem %s808_s2, %s213_s23  ;;  %s524_s11 = scalar_lea.vmem %s765_s7, 16 }
  0x4e   : > { %402 = vmatpush3.bf16.msra.mxu0 %v469_v2  ;;  %v221_v4 = vld [vmem:[%s214_s17] sm:$0x1]  ;;  %p525_p3 = scmp.ne.s32.totalorder %s765_s7, %s524_s11  ;;  %p826_p7 = scmp.ne.s32.totalorder %s816_s24, 0 }
  0x4f   : > { %s600_s16 = smov [#allocation7]  }
  0x50   : > { %p526_p8 = pnand %p525_p3, %p826_p7  ;;  %s528_s19 = sshll.u32 %s600_s16, 4  ;;  %s529_s19 = int_to_ptr.vmem [resolvable:$false] %s528_s19 }
  0x51   : > { %404 = vmatmul.mubr.msk.bf16.vlgmr.msra.gmra.mxu0 %vm234_vm1, %v216_v3  ;;  %s530_s20 = scalar_lea.vmem %s529_s19, 32  ;;  %p531_p10 = scmp.lt.s32.totalorder %s765_s7, %s529_s19 }
  0x52   : > { %p527_p9 = pneg %p526_p8  ;;  %p532_p2 = scmp.lt.s32.totalorder %s530_s20, %s524_s11 }
  0x54   : > { %p533_p0 = por %p532_p2, %p531_p10 }
  0x56   : > { %p534_p4 = pnand %p533_p0, %p527_p9 }
 0x111   : > { %v272_v5 = vpop.f32.mrf.mxu0 }
 0x112   : > { %v273_v6 = vadd.f32 %v272_v5, %v221_v4 }
 0x113   : > { %v405_v7 = vpop.f32.mrf.mxu0 }
 0x114   : > { %278 = vst [vmem:[%s211_s27] sm:$0x1] %v273_v6 }
 0x115   : > { %v275_v8 = vpop.f32.mrf.mxu0 }
 0x116   : > { %537 = shalt.err (!%p534_p4)
}
 0x117   : > { %s538_s28 = scalar_lea.hbm %s763_s9, 16  ;;  %s542_s6 = scalar_lea.hbm %s809_s3, 32 }
 0x118   : > { %p539_p11 = scmp.ne.s32.totalorder %s763_s9, %s538_s28  ;;  %p543_p1 = scmp.lt.s32.totalorder %s763_s9, %s809_s3 }
 0x119   : > { %p544_p6 = scmp.lt.s32.totalorder %s542_s6, %s538_s28 }
 0x11a   : > { %p540_p5 = pnand %p539_p11, %p826_p7 }
 0x11b   : > { %p545_p13 = por %p544_p6, %p543_p1 }
 0x11c   : > { %p541_p12 = pneg %p540_p5 }
 0x11e   : > { %p546_p3 = pnand %p545_p13, %p541_p12 }
 0x120   : > { %549 = shalt.err (!%p546_p3)
}
 0x121   : > { %413 = dma.vmem_to_hbm [thread:$0]  (%p826_p7), %s765_s7, 16, %s763_s9, %s280_s10   ;;  %v406_v9 = vpop.f32.mrf.mxu0 }
 0x122 PF: > { %s304_s4 = sand.u32 1, %s580_s12   ;;  %p827_p8 = scmp.ne.s32.totalorder %s817_s25, 0 }
 0x123   : > { %p828_p9 = scmp.ge.s32.totalorder %s592_s15, 2  ;;  %s305_s17 = scalar_lea.sflag [#allocation4], %s304_s4 }
 0x125   : > { %p424_p10 = pnand %p828_p9, %p827_p8 }
 0x127   : > { %p425_p2 = pneg %p424_p10 }
 0x129   : > { %575 = dma.done.wait (%p425_p2), %s305_s17, 16  }
 0x12a   : > { %577 = vsyncadd (%p425_p2), %s305_s17, 4294967280  ;;  %p17_p0 = scmp.ge.s32.totalorder %s646_s18, 4   ;;  %s829_s12 = smov %s584_s13 }
 0x12b   : > { %s830_s13 = smov %s588_s14  ;;  %s831_s14 = smov %s658_s21 }
 0x12c   : > { %s832_s15 = smov %s646_s18  ;;  %19 = sbr.rel (!%p17_p0) target bundleno = 6 (0x6), region = 85 }
 0x131   :  { %309 = vsyncpa [#allocation3], 1 }
 0x132   :  { %311 = vsyncpa [#allocation3 + $0x1], 1 }
 0x133   :  { %312 = vsyncpa [#allocation6], 1 }
 0x134   :  { %314 = vsyncpa [#allocation6 + $0x1], 1 }
 0x135   :  { %315 = vsyncpa [#allocation4], 1 }
 0x136   :  { %317 = vsyncpa [#allocation4 + $0x1], 1 }

</bundles_post_ra>
